<compile_context>
chip_gen: v6e
topology: v6e:2x2x1
jax: 0.10.0
libtpu: 0.0.40
codegen_flags: <defaults>
</compile_context>

<pallas_src>
import functools

import jax
import jax.numpy as jnp
from jax.experimental import pallas as pl
from jax.experimental.pallas import tpu as pltpu


def _round_up(x, m):
    return ((x + m - 1) // m) * m


def _sublane_multiple(dtype):
    # Min second-to-last block dim per dtype packing: f32 -> 8, bf16 -> 16, int8/fp8 -> 32.
    return {4: 8, 2: 16, 1: 32}[jnp.dtype(dtype).itemsize]


def _pick_tile(dim, target, multiple, prefer=None):
    """Largest tile <= target that divides `dim` and is a multiple of `multiple`.

    `dim` must itself be a multiple of `multiple`.  If `prefer` is given
    (e.g. 256 for the v6e/v7x MXU), a prefer-aligned divisor is tried first.
    """
    if dim <= target:
        return dim
    for step in [s for s in (prefer, multiple) if s]:
        cand = (min(target, dim) // step) * step
        while cand >= step:
            if dim % cand == 0:
                return cand
            cand -= step
    return multiple


def _linear_kernel_acc_out(x_ref, w_ref, b_ref, o_ref):
    """f32 output: accumulate directly into the resident output block (no scratch)."""
    k = pl.program_id(2)

    @pl.when(k == 0)
    def _():
        o_ref[...] = jnp.zeros_like(o_ref)

    o_ref[...] += jnp.dot(x_ref[...], w_ref[...], preferred_element_type=jnp.float32)

    @pl.when(k == pl.num_programs(2) - 1)
    def _():
        o_ref[...] += b_ref[...]  # (1, tn) broadcasts over (tm, tn); added exactly once.


def _linear_kernel_scratch(x_ref, w_ref, b_ref, o_ref, acc_ref):
    """Non-f32 output: f32 VMEM accumulator, bias + downcast on the final K step."""
    k = pl.program_id(2)

    @pl.when(k == 0)
    def _():
        acc_ref[...] = jnp.zeros_like(acc_ref)

    acc_ref[...] += jnp.dot(x_ref[...], w_ref[...], preferred_element_type=jnp.float32)

    @pl.when(k == pl.num_programs(2) - 1)
    def _():
        o_ref[...] = (acc_ref[...] + b_ref[...]).astype(o_ref.dtype)


@functools.partial(
    jax.jit, static_argnames=("tm_target", "tn_target", "tk_target", "compute_dtype")
)
def linear_forward(
    x, w, b, *, tm_target=512, tn_target=1024, tk_target=512, compute_dtype=jnp.bfloat16
):
    """y = x @ w + b, equivalent to torch nn.Linear(in_dim, out_dim)(x).

    x: (..., K); w: (K, N); b: (N,).  x/w are streamed in `compute_dtype` (bf16 by
    default, MXU-native) and accumulated in f32; output keeps x's dtype.
    """
    orig_shape = x.shape
    K = orig_shape[-1]
    x2 = x.reshape(-1, K)
    M = x2.shape[0]
    K2, N = w.shape
    assert K == K2, (K, K2)
    out_dtype = x.dtype

    comp_isz = jnp.dtype(compute_dtype).itemsize
    out_isz = jnp.dtype(out_dtype).itemsize
    sub = _sublane_multiple(compute_dtype)

    # --- pad to minimal layout multiples FIRST, then pick divisor tiles -------------
    Mp = _round_up(M, sub)     # sublane multiple of the streamed dtype
    Kp = _round_up(K, 128)     # lane multiple (also covers the w sublane requirement)
    Np = _round_up(N, 128)

    tm = _pick_tile(Mp, tm_target, sub)
    tn = _pick_tile(Np, tn_target, 128, prefer=256)
    tk = _pick_tile(Kp, tk_target, 128, prefer=256)

    # v7x megacore: make sure the "parallel" axes produce >= 2 blocks when possible.
    if (Mp // tm) * (Np // tn) < 2:
        if Np // 128 >= 2:
            tn = _pick_tile(Np, Np // 2, 128)
        elif Mp // sub >= 2:
            tm = _pick_tile(Mp, Mp // 2, sub)

    # --- wrapper-side casts / pads (pads only when actually needed) -----------------
    xp = x2.astype(compute_dtype)
    if (Mp, Kp) != (M, K):
        xp = jnp.pad(xp, ((0, Mp - M), (0, Kp - K)))  # zero K-pad -> dot unaffected
    wp = w.astype(compute_dtype)
    if (Kp, Np) != (K, N):
        wp = jnp.pad(wp, ((0, Kp - K), (0, Np - N)))
    bp = b.astype(jnp.float32)
    if Np != N:
        bp = jnp.pad(bp, (0, Np - N))
    bp = bp.reshape(1, Np)

    grid = (Mp // tm, Np // tn, Kp // tk)

    # --- f32 output accumulates straight into o_ref; others use an f32 scratch ------
    use_scratch = jnp.dtype(out_dtype) != jnp.dtype(jnp.float32)
    kernel = _linear_kernel_scratch if use_scratch else _linear_kernel_acc_out
    scratch_shapes = [pltpu.VMEM((tm, tn), jnp.float32)] if use_scratch else []

    # --- VMEM budget: double-buffered inputs/output (+ accumulator) + margin --------
    vmem_bytes = 2 * (tm * tk * comp_isz + tk * tn * comp_isz + tn * 4 + tm * tn * out_isz)
    if use_scratch:
        vmem_bytes += tm * tn * 4
    vmem_limit = int(min(max(vmem_bytes + (8 << 20), 32 << 20), 48 << 20))

    # --- cost estimate including x / w re-read factors ------------------------------
    cost = pl.CostEstimate(
        flops=2 * Mp * Np * Kp,
        transcendentals=0,
        bytes_accessed=int(
            (Np // tn) * Mp * Kp * comp_isz      # x streamed once per N block-column
            + (Mp // tm) * Kp * Np * comp_isz    # w streamed once per M block-row
            + (Mp // tm) * Np * 4                # bias per output block-row
            + Mp * Np * out_isz                  # output written once
        ),
    )

    yp = pl.pallas_call(
        kernel,
        out_shape=jax.ShapeDtypeStruct((Mp, Np), out_dtype),
        grid_spec=pltpu.PrefetchScalarGridSpec(
            num_scalar_prefetch=0,
            grid=grid,
            in_specs=[
                pl.BlockSpec((tm, tk), lambda i, j, k: (i, k)),   # x tile
                pl.BlockSpec((tk, tn), lambda i, j, k: (k, j)),   # w tile
                pl.BlockSpec((1, tn), lambda i, j, k: (0, j)),    # bias tile (per N block)
            ],
            out_specs=pl.BlockSpec((tm, tn), lambda i, j, k: (i, j)),
            scratch_shapes=scratch_shapes,
        ),
        compiler_params=pltpu.CompilerParams(
            dimension_semantics=("parallel", "parallel", "arbitrary"),
            vmem_limit_bytes=vmem_limit,
        ),
        cost_estimate=cost,
    )(xp, wp, bp)

    y = yp[:M, :N] if (Mp, Np) != (M, N) else yp
    return y.reshape(orig_shape[:-1] + (N,))


def init_linear_params(key, in_dim, out_dim, dtype=jnp.float32):
    # xavier_normal_ on torch weight of shape (out_dim, in_dim):
    # std = sqrt(2 / (fan_in + fan_out)) = sqrt(2 / (in_dim + out_dim))
    std = (2.0 / (in_dim + out_dim)) ** 0.5
    w_t = jax.random.normal(key, (out_dim, in_dim), dtype=dtype) * std
    w = w_t.T                                    # store as (in_dim, out_dim)
    b = jnp.zeros((out_dim,), dtype=dtype)       # bias.data.fill_(0.0)
    return w, b


if __name__ == "__main__":
    key = jax.random.PRNGKey(0)
    k_x, k_w = jax.random.split(key)

    # Small shapes matching the module's forward: x (batch, in_dim) -> (batch, out_dim).
    batch, in_dim, out_dim = 8, 32, 16
    x = jax.random.normal(k_x, (batch, in_dim), dtype=jnp.float32)
    w, b = init_linear_params(k_w, in_dim, out_dim)

    y = linear_forward(x, w, b)
    jax.block_until_ready(y)

    y_ref = x @ w + b
    assert y.shape == (batch, out_dim)
    # bf16 operand streaming with f32 accumulation -> bf16-class accuracy.
    assert jnp.allclose(y, y_ref, atol=5e-2, rtol=5e-2), float(jnp.max(jnp.abs(y - y_ref)))

    # Non-power-of-two shape exercising K tiling, N splitting and the nonzero-bias path.
    Mb, Kb, Nb = 512, 640, 768
    kx2, kw2 = jax.random.split(k_w)
    xb = jax.random.normal(kx2, (Mb, Kb), dtype=jnp.float32)
    wb, bb = init_linear_params(kw2, Kb, Nb)
    bb = bb + 0.5  # nonzero bias to check the k==last bias path
    yb = linear_forward(xb, wb, bb)
    jax.block_until_ready(yb)
    yb_ref = xb @ wb + bb
    err = float(jnp.max(jnp.abs(yb - yb_ref)))
    assert err < 7.5e-2, err

    print("KERNEL_OK")
</pallas_src>

<mosaic_0001>
module attributes {stable_mosaic.version = 11 : i64} {
  func.func @_linear_kernel_acc_out(%arg0: i32, %arg1: i32, %arg2: i32, %arg3: memref<16x128xbf16, #tpu.memory_space<vmem>>, %arg4: memref<128x128xbf16, #tpu.memory_space<vmem>>, %arg5: memref<1x128xf32, #tpu.memory_space<vmem>>, %arg6: memref<16x128xf32, #tpu.memory_space<vmem>>) attributes {dimension_semantics = [#tpu.dimension_semantics<parallel>, #tpu.dimension_semantics<parallel>, #tpu.dimension_semantics<arbitrary>], iteration_bounds = array<i64: 1, 1, 1>, scalar_prefetch = 0 : i64, scratch_operands = 0 : i64, tpu.core_type = #tpu.core_type<tc>, window_params = [{transform_indices = @transform_0, window_bounds = array<i64: 16, 128>}, {transform_indices = @transform_1, window_bounds = array<i64: 128, 128>}, {transform_indices = @transform_2, window_bounds = array<i64: 1, 128>}, {transform_indices = @transform_3, window_bounds = array<i64: 16, 128>}]} {
    %c0_i32 = arith.constant 0 : i32
    %0 = arith.cmpi eq, %arg2, %c0_i32 : i32
    %1 = arith.extui %0 : i1 to i32
    %c0_i32_0 = arith.constant 0 : i32
    %2 = arith.cmpi ne, %1, %c0_i32_0 : i32
    scf.if %2 {
      %cst_10 = arith.constant 0.000000e+00 : f32
      %12 = vector.broadcast %cst_10 : f32 to vector<16x128xf32>
      %c0_11 = arith.constant 0 : index
      %c0_12 = arith.constant 0 : index
      %13 = vector.load %arg6[%c0_11, %c0_12] : memref<16x128xf32, #tpu.memory_space<vmem>>, vector<16x128xf32>
      tpu.vector_store %arg6[%c0_11, %c0_12], %12 {strides = array<i32>} : memref<16x128xf32, #tpu.memory_space<vmem>>, vector<16x128xf32>,
    } else {
    }
    %c0 = arith.constant 0 : index
    %c0_1 = arith.constant 0 : index
    %3 = vector.load %arg6[%c0, %c0_1] : memref<16x128xf32, #tpu.memory_space<vmem>>, vector<16x128xf32>
    %c0_2 = arith.constant 0 : index
    %c0_3 = arith.constant 0 : index
    %4 = vector.load %arg3[%c0_2, %c0_3] : memref<16x128xbf16, #tpu.memory_space<vmem>>, vector<16x128xbf16>
    %c0_4 = arith.constant 0 : index
    %c0_5 = arith.constant 0 : index
    %5 = vector.load %arg4[%c0_4, %c0_5] : memref<128x128xbf16, #tpu.memory_space<vmem>>, vector<128x128xbf16>
    %cst = arith.constant dense<0.000000e+00> : vector<16x128xf32>
    %6 = tpu.matmul %4, %5, %cst {dimension_numbers = #tpu.dot_dimension_numbers<[1], [0], [0], [1], [0, 0, 1, 1], [], []>} : vector<16x128xbf16>, vector<128x128xbf16>, vector<16x128xf32> -> vector<16x128xf32>
    %7 = arith.addf %3, %6 : vector<16x128xf32>
    %c0_6 = arith.constant 0 : index
    %c0_7 = arith.constant 0 : index
    %8 = vector.load %arg6[%c0_6, %c0_7] : memref<16x128xf32, #tpu.memory_space<vmem>>, vector<16x128xf32>
    tpu.vector_store %arg6[%c0_6, %c0_7], %7 {strides = array<i32>} : memref<16x128xf32, #tpu.memory_space<vmem>>, vector<16x128xf32>,
    %c0_i32_8 = arith.constant 0 : i32
    %9 = arith.cmpi eq, %arg2, %c0_i32_8 : i32
    %10 = arith.extui %9 : i1 to i32
    %c0_i32_9 = arith.constant 0 : i32
    %11 = arith.cmpi ne, %10, %c0_i32_9 : i32
    scf.if %11 {
      %c0_10 = arith.constant 0 : index
      %c0_11 = arith.constant 0 : index
      %12 = vector.load %arg6[%c0_10, %c0_11] : memref<16x128xf32, #tpu.memory_space<vmem>>, vector<16x128xf32>
      %c0_12 = arith.constant 0 : index
      %c0_13 = arith.constant 0 : index
      %13 = vector.load %arg5[%c0_12, %c0_13] : memref<1x128xf32, #tpu.memory_space<vmem>>, vector<1x128xf32>
      %14 = vector.broadcast %13 : vector<1x128xf32> to vector<16x128xf32>
      %15 = arith.addf %12, %14 : vector<16x128xf32>
      %c0_14 = arith.constant 0 : index
      %c0_15 = arith.constant 0 : index
      %16 = vector.load %arg6[%c0_14, %c0_15] : memref<16x128xf32, #tpu.memory_space<vmem>>, vector<16x128xf32>
      tpu.vector_store %arg6[%c0_14, %c0_15], %15 {strides = array<i32>} : memref<16x128xf32, #tpu.memory_space<vmem>>, vector<16x128xf32>,
    } else {
    }
    return
  }
  func.func @transform_0(%arg0: i32, %arg1: i32, %arg2: i32) -> (i32, i32) {
    %c0_i32 = arith.constant 0 : i32
    return %arg0, %arg2 : i32, i32
  }
  func.func @transform_1(%arg0: i32, %arg1: i32, %arg2: i32) -> (i32, i32) {
    %c0_i32 = arith.constant 0 : i32
    return %arg2, %arg1 : i32, i32
  }
  func.func @transform_2(%arg0: i32, %arg1: i32, %arg2: i32) -> (i32, i32) {
    %c0_i32 = arith.constant 0 : i32
    %c0_i32_0 = arith.constant 0 : i32
    return %c0_i32, %arg1 : i32, i32
  }
  func.func @transform_3(%arg0: i32, %arg1: i32, %arg2: i32) -> (i32, i32) {
    %c0_i32 = arith.constant 0 : i32
    return %arg0, %arg1 : i32, i32
  }
}

</mosaic_0001>

<bundles_post_ra>
// kernel: linear_forward.1
= control target key start
LH: loop header
LB: loop body
LE: loop exit
PB: predicated region body
PF: predicated region fallthrough
CT: control target
= control target key end

     0   :  { %v210_v0 = vmov 0.0   ;;  %vm211_vm0 = vmmov 0   ;;  %s268_s1 = inlined_call_operand.vmem [shape: bf16[128,128], index: 1, kind: input, shape index: {}]   ;;  %s269_s0 = inlined_call_operand.vmem [shape: bf16[16,128], index: 0, kind: input, shape index: {}]   ;;  %s270_s2 = inlined_call_operand.vmem [shape: f32[1,128], index: 2, kind: input, shape index: {}]   ;;  %s271_s3 = inlined_call_operand.vmem [shape: f32[16,128], index: 3, kind: output, shape index: {}]  }
   0x1   :  { %179 = vmatprep.subr.bf16.mxu0 %v210_v0  ;;  %v201_v1 = vld [vmem:[%s268_s1 + $0x38] sm:$0xff]   ;;  %195 = vmatprep.mubr.msk.bf16.mxu0 %vm211_vm0, %v210_v0  ;;  %v202_v2 = vld [vmem:[%s268_s1 + $0x30] sm:$0xff]   ;;  %v203_v3 = vld [vmem:[%s268_s1 + $0x28] sm:$0xff]  }
   0x2   :  { %180 = vmatpush3.bf16.msra.mxu0 %v201_v1  ;;  %v204_v4 = vld [vmem:[%s268_s1 + $0x20] sm:$0xff]   ;;  %v205_v5 = vld [vmem:[%s268_s1 + $0x18] sm:$0xff]   ;;  %v206_v6 = vld [vmem:[%s268_s1 + $0x10] sm:$0xff]  }
   0x3   :  { %181 = vmatprep.subr.bf16.mxu0 %v210_v0  ;;  %v207_v7 = vld [vmem:[%s268_s1 + $0x8] sm:$0xff]   ;;  %v208_v8 = vld [vmem:[%s268_s1] sm:$0xff]  }
   0x4   :  { %v209_v9 = vld [vmem:[%s269_s0] sm:$0xff]  }
   0x5   :  { %v169_v11 = vld [vmem:[%s270_s2] ss:$0 sm:$0xff] }
   0x6   :  { %182 = vmatpush3.bf16.msra.mxu0 %v202_v2 }
   0x7   :  { %183 = vmatprep.subr.bf16.mxu0 %v210_v0 }
   0xa   :  { %184 = vmatpush3.bf16.msra.mxu0 %v203_v3 }
   0xb   :  { %185 = vmatprep.subr.bf16.mxu0 %v210_v0 }
   0xe   :  { %186 = vmatpush3.bf16.msra.mxu0 %v204_v4 }
   0xf   :  { %187 = vmatprep.subr.bf16.mxu0 %v210_v0 }
  0x12   :  { %188 = vmatpush3.bf16.msra.mxu0 %v205_v5 }
  0x13   :  { %189 = vmatprep.subr.bf16.mxu0 %v210_v0 }
  0x16   :  { %190 = vmatpush3.bf16.msra.mxu0 %v206_v6 }
  0x17   :  { %191 = vmatprep.subr.bf16.mxu0 %v210_v0 }
  0x1a   :  { %192 = vmatpush3.bf16.msra.mxu0 %v207_v7 }
  0x1b   :  { %193 = vmatprep.subr.bf16.mxu0 %v210_v0 }
  0x1e   :  { %194 = vmatpush3.bf16.msra.mxu0 %v208_v8 }
  0x21   :  { %196 = vmatmul.mubr.bf16.vlgmr.msra.gmra.mxu0 %v209_v9 }
  0xe1   :  { %v129_v10 = vpop.f32.mrf.mxu0 }
  0xe2   :  { %v152_v13 = vadd.f32 %v169_v11, %v129_v10 }
  0xe3   :  { %v197_v12 = vpop.f32.mrf.mxu0 }
  0xe4   :  { %154 = vst [vmem:[%s271_s3] sm:$0xff] %v152_v13 }
  0xe5   :  { %v132_v14 = vpop.f32.mrf.mxu0 }
  0xe6   :  { %v153_v16 = vadd.f32 %v169_v11, %v132_v14 }
  0xe7   :  { %v198_v15 = vpop.f32.mrf.mxu0 }
  0xe8   :  { %155 = vst [vmem:[%s271_s3 + $0x8] sm:$0xff] %v153_v16 }

</bundles_post_ra>
